<compile_context>
chip_gen: v7x
topology: tpu7x:2x2x1
jax: 0.10.0
libtpu: 0.0.40
codegen_flags: <defaults>
</compile_context>

<pallas_src>
import math
from functools import lru_cache

import numpy as np

import jax
import jax.numpy as jnp
from jax.experimental import pallas as pl
from jax.experimental.pallas import tpu as pltpu


def _round_up(x: int, m: int) -> int:
    return ((x + m - 1) // m) * m


@lru_cache(maxsize=None)
def _adaptive_pool_matrix_np(in_size: int, out_size: int) -> np.ndarray:
    """Exact AdaptiveAvgPool1d as a dense (out_size, in_size) numpy matrix."""
    mat = np.zeros((out_size, in_size), np.float32)
    for o in range(out_size):
        start = (o * in_size) // out_size
        end = math.ceil((o + 1) * in_size / out_size)
        mat[o, start:end] = 1.0 / (end - start)
    return mat


def patch2vec_kernel(x_ref, w_ref, b_ref, o_ref):
    # x_ref: (tm, CHW)   flattened patch tile (streamed, double-buffered)
    # w_ref: (CHW, E)    fused (pool ∘ linear) weight, resident
    # b_ref: (1, E)      linear bias, resident
    # o_ref: (tm, E)
    o_ref[...] = (
        jnp.dot(x_ref[...], w_ref[...], preferred_element_type=jnp.float32)
        + b_ref[...]
    ).astype(o_ref.dtype)


def make_patch2vec(w, b, *, in_channels, patch_dim, emb_patch_div,
                   tile_m: int = 1024):
    """Build a jitted Patch2vec forward.

    w: (emb_features, fvector_size) PyTorch Linear weight layout, b: (emb,).
    The pool->linear fold is done once here, not per forward call.
    """
    C, H, W = in_channels, patch_dim, patch_dim
    channel_depth = in_channels // 4
    result_size = patch_dim // emb_patch_div
    fvec = channel_depth * result_size * result_size
    emb = int(w.shape[0])
    CHW = C * H * W

    # --- Fold adaptive pooling (exact, kron-separable) into the linear weight.
    Mc = _adaptive_pool_matrix_np(C, channel_depth)
    Mh = _adaptive_pool_matrix_np(H, result_size)
    Mw = _adaptive_pool_matrix_np(W, result_size)
    pool = np.einsum("ab,cd,ef->acebdf", Mc, Mh, Mw).reshape(fvec, CHW)
    # out = (x @ pool.T) @ w.T = x @ (w @ pool).T  ->  W_eff: (CHW, emb)
    w_eff = jnp.asarray(
        np.asarray(w, np.float32) @ pool, jnp.float32).T          # (CHW, emb)
    b2d = jnp.asarray(b, jnp.float32).reshape(1, emb)

    @jax.jit
    def forward(patches):
        B, P, c, h, ww = patches.shape
        assert (c, h, ww) == (C, H, W)
        M = B * P
        x_flat = patches.reshape(M, CHW)          # no astype, no pad

        # Tile M: multiple of 8 sublanes; ensure >=2 grid steps when M allows
        # so the 'parallel' axis can feed both v7x TensorCores.
        tm = max(8, min(tile_m, _round_up(pl.cdiv(M, 2), 8)))
        grid_m = pl.cdiv(M, tm)

        itemsize = jnp.dtype(x_flat.dtype).itemsize
        vmem_bytes = (
            2 * tm * CHW * itemsize     # double-buffered x tiles
            + 2 * tm * emb * 4          # double-buffered out tiles
            + 2 * CHW * emb * 4         # weight (resident, budget 2x)
            + 2 * emb * 4               # bias
            + (2 << 20)                 # slack
        )
        vmem_limit = int(min(max(vmem_bytes, 32 << 20), 64 << 20))

        cost = pl.CostEstimate(
            flops=2 * M * CHW * emb,
            transcendentals=0,
            bytes_accessed=itemsize * M * CHW
            + 4 * (M * emb + CHW * emb + emb),
        )

        out = pl.pallas_call(
            patch2vec_kernel,
            out_shape=jax.ShapeDtypeStruct((M, emb), jnp.float32),
            grid_spec=pl.GridSpec(
                grid=(grid_m,),
                in_specs=[
                    pl.BlockSpec((tm, CHW), lambda i: (i, 0)),   # streamed x
                    pl.BlockSpec((CHW, emb), lambda i: (0, 0)),  # resident W_eff
                    pl.BlockSpec((1, emb), lambda i: (0, 0)),    # resident bias
                ],
                out_specs=pl.BlockSpec((tm, emb), lambda i: (i, 0)),
            ),
            compiler_params=pltpu.CompilerParams(
                dimension_semantics=("parallel",),
                vmem_limit_bytes=vmem_limit,
            ),
            cost_estimate=cost,
        )(x_flat, w_eff, b2d)

        return out.reshape(B, P, emb)

    return forward


if __name__ == "__main__":
    # Module hyper-params (small, consistent with __init__ constraints).
    in_channels = 4
    emb_features = 32
    patch_dim = 16
    emb_patch_div = 4
    num_heads = 2  # unused by forward

    channel_depth = in_channels // 4
    result_size = patch_dim // emb_patch_div
    fvec = channel_depth * result_size * result_size

    B, P = 2, 8
    key = jax.random.PRNGKey(0)
    k_x, k_w, k_b = jax.random.split(key, 3)

    patches = jax.random.normal(
        k_x, (B, P, in_channels, patch_dim, patch_dim), jnp.float32)
    # Deterministic Linear init (PyTorch-style uniform bound).
    bound = 1.0 / math.sqrt(fvec)
    w = jax.random.uniform(k_w, (emb_features, fvec), jnp.float32, -bound, bound)
    b = jax.random.uniform(k_b, (emb_features,), jnp.float32, -bound, bound)

    patch2vec = make_patch2vec(
        w, b, in_channels=in_channels, patch_dim=patch_dim,
        emb_patch_div=emb_patch_div)

    out = patch2vec(patches)
    jax.block_until_ready(out)

    # Pure-JAX reference (divisible case: adaptive pool == uniform block mean).
    x = patches.reshape(B * P, in_channels, patch_dim, patch_dim)
    pooled_ref = x.reshape(
        B * P,
        channel_depth, in_channels // channel_depth,
        result_size, patch_dim // result_size,
        result_size, patch_dim // result_size,
    ).mean(axis=(2, 4, 6)).reshape(B * P, fvec)
    out_ref = (pooled_ref @ w.T + b).reshape(B, P, emb_features)
    assert out.shape == (B, P, emb_features)
    assert jnp.allclose(out, out_ref, atol=1e-4, rtol=1e-4)

    print("KERNEL_OK")
</pallas_src>

<mosaic_0001>
module attributes {stable_mosaic.version = 11 : i64} {
  func.func @patch2vec_kernel(%arg0: i32, %arg1: memref<8x1024xf32, #tpu.memory_space<vmem>>, %arg2: memref<1024x32xf32, #tpu.memory_space<vmem>>, %arg3: memref<1x32xf32, #tpu.memory_space<vmem>>, %arg4: memref<8x32xf32, #tpu.memory_space<vmem>>) attributes {dimension_semantics = [#tpu.dimension_semantics<parallel>], iteration_bounds = array<i64: 2>, scalar_prefetch = 0 : i64, scratch_operands = 0 : i64, tpu.core_type = #tpu.core_type<tc>, window_params = [{transform_indices = @transform_0, window_bounds = array<i64: 8, 1024>}, {pipeline_mode = #tpu.pipeline_mode<synchronous>, transform_indices = @transform_1, window_bounds = array<i64: 1024, 32>}, {pipeline_mode = #tpu.pipeline_mode<synchronous>, transform_indices = @transform_2, window_bounds = array<i64: 1, 32>}, {transform_indices = @transform_3, window_bounds = array<i64: 8, 32>}]} {
    %c0 = arith.constant 0 : index
    %c0_0 = arith.constant 0 : index
    %0 = vector.load %arg1[%c0, %c0_0] : memref<8x1024xf32, #tpu.memory_space<vmem>>, vector<8x1024xf32>
    %c0_1 = arith.constant 0 : index
    %c0_2 = arith.constant 0 : index
    %1 = vector.load %arg2[%c0_1, %c0_2] : memref<1024x32xf32, #tpu.memory_space<vmem>>, vector<1024x32xf32>
    %cst = arith.constant dense<0.000000e+00> : vector<8x32xf32>
    %2 = tpu.matmul %0, %1, %cst {dimension_numbers = #tpu.dot_dimension_numbers<[1], [0], [0], [1], [0, 0, 1, 1], [], []>} : vector<8x1024xf32>, vector<1024x32xf32>, vector<8x32xf32> -> vector<8x32xf32>
    %c0_3 = arith.constant 0 : index
    %c0_4 = arith.constant 0 : index
    %3 = vector.load %arg3[%c0_3, %c0_4] : memref<1x32xf32, #tpu.memory_space<vmem>>, vector<1x32xf32>
    %4 = vector.broadcast %3 : vector<1x32xf32> to vector<8x32xf32>
    %5 = arith.addf %2, %4 : vector<8x32xf32>
    %c0_5 = arith.constant 0 : index
    %c0_6 = arith.constant 0 : index
    %6 = vector.load %arg4[%c0_5, %c0_6] : memref<8x32xf32, #tpu.memory_space<vmem>>, vector<8x32xf32>
    tpu.vector_store %arg4[%c0_5, %c0_6], %5 {strides = array<i32>} : memref<8x32xf32, #tpu.memory_space<vmem>>, vector<8x32xf32>,
    return
  }
  func.func @transform_0(%arg0: i32) -> (i32, i32) {
    %c0_i32 = arith.constant 0 : i32
    %c0_i32_0 = arith.constant 0 : i32
    return %arg0, %c0_i32 : i32, i32
  }
  func.func @transform_1(%arg0: i32) -> (i32, i32) {
    %c0_i32 = arith.constant 0 : i32
    %c0_i32_0 = arith.constant 0 : i32
    %c0_i32_1 = arith.constant 0 : i32
    return %c0_i32, %c0_i32_0 : i32, i32
  }
  func.func @transform_2(%arg0: i32) -> (i32, i32) {
    %c0_i32 = arith.constant 0 : i32
    %c0_i32_0 = arith.constant 0 : i32
    %c0_i32_1 = arith.constant 0 : i32
    return %c0_i32, %c0_i32_0 : i32, i32
  }
  func.func @transform_3(%arg0: i32) -> (i32, i32) {
    %c0_i32 = arith.constant 0 : i32
    %c0_i32_0 = arith.constant 0 : i32
    return %arg0, %c0_i32 : i32, i32
  }
}

</mosaic_0001>

<bundles_post_ra>
// kernel: forward.1
= control target key start
LH: loop header
LB: loop body
LE: loop exit
PB: predicated region body
PF: predicated region fallthrough
CT: control target
= control target key end

     0   :  { %8 = vsyncpa [#allocation3], 0  ;;  %s1574_s0 = inlined_call_operand.vmem [shape: f32[16,1024], index: 0, kind: input, shape index: {}]   ;;  %s1575_s1 = inlined_call_operand.vmem [shape: f32[1024,32], index: 1, kind: input, shape index: {}]   ;;  %s1576_s2 = inlined_call_operand.vmem [shape: f32[1,32], index: 2, kind: input, shape index: {}]   ;;  %s1577_s3 = inlined_call_operand.hbm [shape: f32[16,32], index: 3, kind: output, shape index: {}]  }
   0x1   :  { %10 = vsyncpa [#allocation3 + $0x1], 0  ;;  %s1072_s12 = smov 0   ;;  %s1074_s13 = smov 0  }
   0x2   :  { %s1076_s14 = smov 0   ;;  %s1078_s15 = smov 0  }
   0x3 LB: > { %s1093_s16 = sadd.s32 4294967295, %s1049_s15   ;;  %s667_s17 = sadd.s32 4294967294, %s1049_s15   ;;  %s1049_s15 = sphi %s1078_s15, %s1583_s15   ;;  %s1045_s14 = sphi %s1076_s14, %s1582_s14   ;;  %s1041_s13 = sphi %s1074_s13, %s1581_s13   ;;  %s1037_s12 = sphi %s1072_s12, %s1580_s12  }
   0x4   : > { %s1097_s18 = sadd.s32 1, %s1049_s15   ;;  %s91_s19 = sadd.s32 1, %s1045_s14 }
   0x5   : > { %s88_s20 = ssub.s32 %s1049_s15, %s1097_s18  ;;  %p101_p0 = scmp.ne.s32.totalorder %s1045_s14, %s1041_s13 }
   0x6   : > { %p89_p1 = scmp.eq.s32.totalorder %s88_s20, 0  ;;  %p102_p2 = scmp.eq.s32.totalorder %s1093_s16, 1 }
   0x7   : > { %p107_p3 = scmp.ne.s32.totalorder %s1041_s13, %s1037_s12  ;;  %p108_p4 = scmp.eq.s32.totalorder %s667_s17, 1 }
   0x8   : > { %s1108_s21 = scalar_select %p89_p1, %s1045_s14, %s91_s19  }
   0x9   : > { %p1110_p5 = por %p102_p2, %p101_p0  ;;  %p1114_p6 = por %p108_p4, %p107_p3 }
   0xa   : > { %p670_p7 = scmp.ge.s32.totalorder %s1049_s15, 1  ;;  %p140_p8 = scmp.lt.s32.totalorder %s1049_s15, 3 }
   0xc   : > { %p141_p9 = pnand %p670_p7, %p140_p8 }
   0xd   : > { %v193_v0 = vld [vmem:[%s1575_s1 + $0x80] sm:$0xff] (!%p141_p9)  ;;  %v194_v1 = vld [vmem:[%s1575_s1 + $0x88] sm:$0xff] (!%p141_p9)  ;;  %v195_v11 = vld [vmem:[%s1575_s1 + $0x90] sm:$0xff] (!%p141_p9)  ;;  %p164_p10 = scmp.lt.s32.totalorder (!%p141_p9), %s1093_s16, 1  ;;  %s161_s28 = sand.u32 (!%p141_p9), 1, %s1041_s13   ;;  %vm592_vm0 = vcmask (!%p141_p9), 261120  }
   0xe   : > { %144 = sbr.rel (%p141_p9) target bundleno = 313 (0x139), region = 32  ;;  %v177_v2 = vld [vmem:[%s1575_s1] sm:$0xff] (!%p141_p9)  ;;  %v820_v3 = vpack.c.bf16 (!%p141_p9), %v194_v1, %v193_v0  ;;  %v178_v4 = vld [vmem:[%s1575_s1 + $0x8] sm:$0xff] (!%p141_p9)  ;;  %v196_v13 = vld [vmem:[%s1575_s1 + $0x98] sm:$0xff] (!%p141_p9)  ;;  %s671_s29 = sshll.u32 (!%p141_p9), %s161_s28, 3 }
   0xf   : > { %v225_v5 = vld [vmem:[%s1575_s1 + $0x180] sm:$0xff] (!%p141_p9)  ;;  %v226_v6 = vld [vmem:[%s1575_s1 + $0x188] sm:$0xff] (!%p141_p9)  ;;  %v822_v7 = vpack.c.bf16 (!%p141_p9), %v178_v4, %v177_v2  ;;  %v179_v14 = vld [vmem:[%s1575_s1 + $0x10] sm:$0xff] (!%p141_p9)  ;;  %v824_v16 = vpack.c.bf16 (!%p141_p9), %v196_v13, %v195_v11  ;;  %s163_s30 = scalar_lea.vmem (!%p141_p9), [#allocation2], %s671_s29  ;;  %s595_s6 = scalar_lea.sflag (!%p141_p9), [#allocation3], %s161_s28 }
  0x10   : > { %v852_v8 = vpack.c.bf16 (!%p141_p9), %v226_v6, %v225_v5  ;;  %v209_v9 = vld [vmem:[%s1575_s1 + $0x100] sm:$0xff] (!%p141_p9)  ;;  %v210_v10 = vld [vmem:[%s1575_s1 + $0x108] sm:$0xff] (!%p141_p9)  ;;  %821 = vmatprep.subr.bf16.mxu0 (!%p141_p9), %v820_v3  ;;  %v180_v15 = vld [vmem:[%s1575_s1 + $0x18] sm:$0xff] (!%p141_p9) }
  0x11   : > { %v854_v12 = vpack.c.bf16 (!%p141_p9), %v210_v10, %v209_v9  ;;  %823 = vmatpush3.bf16.msra.mxu0 (!%p141_p9), %v822_v7  ;;  %v826_v17 = vpack.c.bf16 (!%p141_p9), %v180_v15, %v179_v14  ;;  %v227_v18 = vld [vmem:[%s1575_s1 + $0x190] sm:$0xff] (!%p141_p9)  ;;  %v228_v19 = vld [vmem:[%s1575_s1 + $0x198] sm:$0xff] (!%p141_p9)  ;;  %v197_v23 = vld [vmem:[%s1575_s1 + $0xa0] sm:$0xff] (!%p141_p9) }
  0x12   : > { %853 = vmatprep.subr.bf16.mxu1 (!%p141_p9), %v852_v8  ;;  %v211_v20 = vld [vmem:[%s1575_s1 + $0x110] sm:$0xff] (!%p141_p9)  ;;  %v856_v21 = vpack.c.bf16 (!%p141_p9), %v228_v19, %v227_v18  ;;  %v212_v22 = vld [vmem:[%s1575_s1 + $0x118] sm:$0xff] (!%p141_p9)  ;;  %v198_v24 = vld [vmem:[%s1575_s1 + $0xa8] sm:$0xff] (!%p141_p9)  ;;  %825 = vmatprep.subr.bf16.mxu0 (!%p141_p9), %v824_v16 }
  0x13   : > { %855 = vmatpush3.bf16.msra.mxu1 (!%p141_p9), %v854_v12  ;;  %v858_v25 = vpack.c.bf16 (!%p141_p9), %v212_v22, %v211_v20  ;;  %v828_v26 = vpack.c.bf16 (!%p141_p9), %v198_v24, %v197_v23  ;;  %v181_v27 = vld [vmem:[%s1575_s1 + $0x20] sm:$0xff] (!%p141_p9)  ;;  %v182_v28 = vld [vmem:[%s1575_s1 + $0x28] sm:$0xff] (!%p141_p9)  ;;  %v199_v35 = vld [vmem:[%s1575_s1 + $0xb0] sm:$0xff] (!%p141_p9) }
  0x14   : > { %v229_v29 = vld [vmem:[%s1575_s1 + $0x1a0] sm:$0xff] (!%p141_p9)  ;;  %857 = vmatprep.subr.bf16.mxu1 (!%p141_p9), %v856_v21  ;;  %v230_v30 = vld [vmem:[%s1575_s1 + $0x1a8] sm:$0xff] (!%p141_p9)  ;;  %v830_v33 = vpack.c.bf16 (!%p141_p9), %v182_v28, %v181_v27  ;;  %v200_v36 = vld [vmem:[%s1575_s1 + $0xb8] sm:$0xff] (!%p141_p9) }
  0x15   : > { %v213_v31 = vld [vmem:[%s1575_s1 + $0x120] sm:$0xff]  ;;  %v214_v32 = vld [vmem:[%s1575_s1 + $0x128] sm:$0xff]  ;;  %827 = vmatpush3.bf16.msra.mxu0 %v826_v17  ;;  %v860_v34 = vpack.c.bf16 %v230_v30, %v229_v29  ;;  %v183_v37 = vld [vmem:[%s1575_s1 + $0x30] sm:$0xff]  ;;  %v832_v39 = vpack.c.bf16 %v200_v36, %v199_v35  ;;  %s1226_s11 = scalar_select %p164_p10, %s1093_s16, 1 }
  0x16   : > { %829 = vmatprep.subr.bf16.mxu0 %v828_v26  ;;  %v862_v38 = vpack.c.bf16 %v214_v32, %v213_v31  ;;  %v184_v40 = vld [vmem:[%s1575_s1 + $0x38] sm:$0xff]  ;;  %v231_v41 = vld [vmem:[%s1575_s1 + $0x1b0] sm:$0xff]  ;;  %v201_v46 = vld [vmem:[%s1575_s1 + $0xc0] sm:$0xff] }
  0x17   : > { %859 = vmatpush3.bf16.msra.mxu1 %v858_v25  ;;  %v232_v42 = vld [vmem:[%s1575_s1 + $0x1b8] sm:$0xff]  ;;  %v215_v44 = vld [vmem:[%s1575_s1 + $0x130] sm:$0xff]  ;;  %v202_v47 = vld [vmem:[%s1575_s1 + $0xc8] sm:$0xff]  ;;  %v834_v48 = vpack.c.bf16 %v184_v40, %v183_v37  ;;  %s679_s24 = sshll.u32 %s1226_s11, 6 }
  0x18   : > { %861 = vmatprep.subr.bf16.mxu1 %v860_v34  ;;  %v864_v43 = vpack.c.bf16 %v232_v42, %v231_v41  ;;  %v216_v45 = vld [vmem:[%s1575_s1 + $0x138] sm:$0xff]  ;;  %v233_v49 = vld [vmem:[%s1575_s1 + $0x1c0] sm:$0xff]  ;;  %v234_v50 = vld [vmem:[%s1575_s1 + $0x1c8] sm:$0xff]  ;;  %v836_v52 = vpack.c.bf16 %v202_v47, %v201_v46  ;;  %s1280_s17 = scalar_lea.vmem %s1574_s0, %s679_s24  ;;  %s608_s24 = sshll.u32 %s163_s30, 4  ;;  %s1534_s24 = int_to_ptr.vmem [resolvable:$true] %s608_s24 }
  0x19   : > { %831 = vmatpush3.bf16.msra.mxu0 %v830_v33  ;;  %v866_v51 = vpack.c.bf16 %v216_v45, %v215_v44  ;;  %v185_v53 = vld [vmem:[%s1575_s1 + $0x40] sm:$0xff]  ;;  %v186_v54 = vld [vmem:[%s1575_s1 + $0x48] sm:$0xff]  ;;  %v868_v56 = vpack.c.bf16 %v234_v50, %v233_v49  ;;  %v203_v58 = vld [vmem:[%s1575_s1 + $0xd0] sm:$0xff]  ;;  %s987_s7 = scalar_lea.vmem %s1534_s24, 128 }
  0x1a   : > { %833 = vmatprep.subr.bf16.mxu0 %v832_v39  ;;  %v217_v55 = vld [vmem:[%s1575_s1 + $0x140] sm:$0xff]  ;;  %v218_v57 = vld [vmem:[%s1575_s1 + $0x148] sm:$0xff]  ;;  %v204_v59 = vld [vmem:[%s1575_s1 + $0xd8] sm:$0xff]  ;;  %v838_v62 = vpack.c.bf16 %v186_v54, %v185_v53  ;;  %p988_p11 = scmp.ne.s32.totalorder %s1534_s24, %s987_s7 }
  0x1b   : > { %863 = vmatpush3.bf16.msra.mxu1 %v862_v38  ;;  %v235_v60 = vld [vmem:[%s1575_s1 + $0x1d0] sm:$0xff]  ;;  %v236_v61 = vld [vmem:[%s1575_s1 + $0x1d8] sm:$0xff]  ;;  %v870_v63 = vpack.c.bf16 %v218_v57, %v217_v55  ;;  %v840_v0 = vpack.c.bf16 %v204_v59, %v203_v58  ;;  %v205_v6 = vld [vmem:[%s1575_s1 + $0xe0] sm:$0xff] }
  0x1c   : > { %865 = vmatprep.subr.bf16.mxu1 %v864_v43  ;;  %v187_v1 = vld [vmem:[%s1575_s1 + $0x50] sm:$0xff]  ;;  %v188_v2 = vld [vmem:[%s1575_s1 + $0x58] sm:$0xff]  ;;  %v872_v4 = vpack.c.bf16 %v236_v61, %v235_v60  ;;  %v206_v7 = vld [vmem:[%s1575_s1 + $0xe8] sm:$0xff]  ;;  %p989_p12 = pnand %p988_p11, %p1110_p5 }
  0x1d   : > { %835 = vmatpush3.bf16.msra.mxu0 %v834_v48  ;;  %v219_v3 = vld [vmem:[%s1575_s1 + $0x150] sm:$0xff]  ;;  %v220_v5 = vld [vmem:[%s1575_s1 + $0x158] sm:$0xff]  ;;  %v237_v8 = vld [vmem:[%s1575_s1 + $0x1e0] sm:$0xff]  ;;  %v842_v10 = vpack.c.bf16 %v188_v2, %v187_v1  ;;  %v844_v14 = vpack.c.bf16 %v206_v7, %v205_v6 }
  0x1e   : > { %837 = vmatprep.subr.bf16.mxu0 %v836_v52  ;;  %v238_v9 = vld [vmem:[%s1575_s1 + $0x1e8] sm:$0xff]  ;;  %v189_v11 = vld [vmem:[%s1575_s1 + $0x60] sm:$0xff]  ;;  %v874_v13 = vpack.c.bf16 %v220_v5, %v219_v3  ;;  %v207_v19 = vld [vmem:[%s1575_s1 + $0xf0] sm:$0xff]  ;;  %p990_p13 = pneg %p989_p12 }
  0x1f   : > { %867 = vmatpush3.bf16.msra.mxu1 %v866_v51  ;;  %v190_v12 = vld [vmem:[%s1575_s1 + $0x68] sm:$0xff]  ;;  %v221_v15 = vld [vmem:[%s1575_s1 + $0x160] sm:$0xff]  ;;  %v876_v18 = vpack.c.bf16 %v238_v9, %v237_v8  ;;  %v208_v20 = vld [vmem:[%s1575_s1 + $0xf8] sm:$0xff] }
  0x20   : > { %869 = vmatprep.subr.bf16.mxu1 %v868_v56  ;;  %v222_v16 = vld [vmem:[%s1575_s1 + $0x168] sm:$0xff]  ;;  %v172_v21 = vld [vmem:[%s1280_s17 + $0x18] sm:$0xff]  ;;  %v239_v22 = vld [vmem:[%s1575_s1 + $0x1f0] sm:$0xff]  ;;  %v846_v24 = vpack.c.bf16 %v190_v12, %v189_v11  ;;  %v848_v26 = vpack.c.bf16 %v208_v20, %v207_v19 }
  0x21   : > { %839 = vmatpush3.bf16.msra.mxu0 %v838_v62  ;;  %v170_v17 = vld [vmem:[%s1280_s17 + $0x8] sm:$0xff]  ;;  %v240_v23 = vld [vmem:[%s1575_s1 + $0x1f8] sm:$0xff]  ;;  %446 = vmatprep.mubr.f32.mxu1 %v172_v21  ;;  %v878_v25 = vpack.c.bf16 %v222_v16, %v221_v15  ;;  %v191_v27 = vld [vmem:[%s1575_s1 + $0x70] sm:$0xff] }
  0x22   : > { %841 = vmatprep.subr.bf16.mxu0 %v840_v0  ;;  %376 = vmatprep.mubr.f32.mxu0 %v170_v17  ;;  %v192_v28 = vld [vmem:[%s1575_s1 + $0x78] sm:$0xff]  ;;  %v223_v29 = vld [vmem:[%s1575_s1 + $0x170] sm:$0xff]  ;;  %v880_v30 = vpack.c.bf16 %v240_v23, %v239_v22  ;;  %v257_v32 = vld [vmem:[%s1575_s1 + $0x280] sm:$0xff] }
  0x23   : > { %871 = vmatpush3.bf16.msra.mxu1 %v870_v63  ;;  %v224_v31 = vld [vmem:[%s1575_s1 + $0x178] sm:$0xff]  ;;  %v258_v33 = vld [vmem:[%s1575_s1 + $0x288] sm:$0xff]  ;;  %v289_v34 = vld [vmem:[%s1575_s1 + $0x380] sm:$0xff]  ;;  %v850_v36 = vpack.c.bf16 %v192_v28, %v191_v27 }
  0x24   : > { %873 = vmatprep.subr.bf16.mxu1 %v872_v4  ;;  %v290_v35 = vld [vmem:[%s1575_s1 + $0x388] sm:$0xff]  ;;  %v882_v37 = vpack.c.bf16 %v224_v31, %v223_v29  ;;  %v884_v38 = vpack.c.bf16 %v258_v33, %v257_v32  ;;  %v241_v39 = vld [vmem:[%s1575_s1 + $0x200] sm:$0xff]  ;;  %v259_v44 = vld [vmem:[%s1575_s1 + $0x290] sm:$0xff] }
  0x25   : > { %843 = vmatpush3.bf16.msra.mxu0 %v842_v10  ;;  %v242_v40 = vld [vmem:[%s1575_s1 + $0x208] sm:$0xff]  ;;  %v273_v41 = vld [vmem:[%s1575_s1 + $0x300] sm:$0xff]  ;;  %v916_v42 = vpack.c.bf16 %v290_v35, %v289_v34  ;;  %v260_v45 = vld [vmem:[%s1575_s1 + $0x298] sm:$0xff] }
  0x26   : > { %845 = vmatprep.subr.bf16.mxu0 %v844_v14  ;;  %v274_v43 = vld [vmem:[%s1575_s1 + $0x308] sm:$0xff]  ;;  %v291_v46 = vld [vmem:[%s1575_s1 + $0x390] sm:$0xff]  ;;  %v292_v47 = vld [vmem:[%s1575_s1 + $0x398] sm:$0xff]  ;;  %v886_v49 = vpack.c.bf16 %v242_v40, %v241_v39  ;;  %v888_v52 = vpack.c.bf16 %v260_v45, %v259_v44 }
  0x27   : > { %875 = vmatpush3.bf16.msra.mxu1 %v874_v13  ;;  %v169_v48 = vld [vmem:[%s1280_s17] sm:$0xff]  ;;  %v171_v50 = vld [vmem:[%s1280_s17 + $0x10] sm:$0xff]  ;;  %v918_v51 = vpack.c.bf16 %v274_v43, %v273_v41  ;;  %v244_v54 = vld [vmem:[%s1575_s1 + $0x218] sm:$0xff]  ;;  %v920_v56 = vpack.c.bf16 %v292_v47, %v291_v46 }
  0x28   : > { %877 = vmatprep.subr.bf16.mxu1 %v876_v18  ;;  %v243_v53 = vld [vmem:[%s1575_s1 + $0x210] sm:$0xff]  ;;  %v276_v57 = vld [vmem:[%s1575_s1 + $0x318] sm:$0xff]  ;;  %v261_v58 = vld [vmem:[%s1575_s1 + $0x2a0] sm:$0xff] }
  0x29   : > { %847 = vmatpush3.bf16.msra.mxu0 %v846_v24  ;;  %v275_v55 = vld [vmem:[%s1575_s1 + $0x310] sm:$0xff]  ;;  %v262_v59 = vld [vmem:[%s1575_s1 + $0x2a8] sm:$0xff]  ;;  %v293_v60 = vld [vmem:[%s1575_s1 + $0x3a0] sm:$0xff]  ;;  %v890_v62 = vpack.c.bf16 %v244_v54, %v243_v53 }
  0x2a   : > { %849 = vmatprep.subr.bf16.mxu0 %v848_v26  ;;  %v294_v61 = vld [vmem:[%s1575_s1 + $0x3a8] sm:$0xff]  ;;  %v922_v63 = vpack.c.bf16 %v276_v57, %v275_v55  ;;  %v892_v0 = vpack.c.bf16 %v262_v59, %v261_v58  ;;  %v245_v1 = vld [vmem:[%s1575_s1 + $0x220] sm:$0xff]  ;;  %v263_v6 = vld [vmem:[%s1575_s1 + $0x2b0] sm:$0xff] }
  0x2b   : > { %879 = vmatpush3.bf16.msra.mxu1 %v878_v25  ;;  %v246_v2 = vld [vmem:[%s1575_s1 + $0x228] sm:$0xff]  ;;  %v277_v3 = vld [vmem:[%s1575_s1 + $0x320] sm:$0xff]  ;;  %v924_v4 = vpack.c.bf16 %v294_v61, %v293_v60  ;;  %v264_v7 = vld [vmem:[%s1575_s1 + $0x2b8] sm:$0xff] }
  0x2c   : > { %881 = vmatprep.subr.bf16.mxu1 %v880_v30  ;;  %v278_v5 = vld [vmem:[%s1575_s1 + $0x328] sm:$0xff]  ;;  %v295_v8 = vld [vmem:[%s1575_s1 + $0x3b0] sm:$0xff]  ;;  %v296_v9 = vld [vmem:[%s1575_s1 + $0x3b8] sm:$0xff]  ;;  %v894_v10 = vpack.c.bf16 %v246_v2, %v245_v1  ;;  %v896_v12 = vpack.c.bf16 %v264_v7, %v263_v6 }
  0x2d   : > { %851 = vmatpush3.bf16.msra.mxu0 %v850_v36  ;;  %v926_v11 = vpack.c.bf16 %v278_v5, %v277_v3  ;;  %v247_v13 = vld [vmem:[%s1575_s1 + $0x230] sm:$0xff]  ;;  %v248_v14 = vld [vmem:[%s1575_s1 + $0x238] sm:$0xff]  ;;  %v928_v16 = vpack.c.bf16 %v296_v9, %v295_v8  ;;  %v265_v18 = vld [vmem:[%s1575_s1 + $0x2c0] sm:$0xff] }
  0x2e   : > { %885 = vmatprep.subr.bf16.mxu0 %v884_v38  ;;  %v279_v15 = vld [vmem:[%s1575_s1 + $0x330] sm:$0xff]  ;;  %v280_v17 = vld [vmem:[%s1575_s1 + $0x338] sm:$0xff]  ;;  %v266_v19 = vld [vmem:[%s1575_s1 + $0x2c8] sm:$0xff]  ;;  %v898_v22 = vpack.c.bf16 %v248_v14, %v247_v13 }
  0x2f   : > { %883 = vmatpush3.bf16.msra.mxu1 %v882_v37  ;;  %v297_v20 = vld [vmem:[%s1575_s1 + $0x3c0] sm:$0xff]  ;;  %v298_v21 = vld [vmem:[%s1575_s1 + $0x3c8] sm:$0xff]  ;;  %v176_v24 = vld [vmem:[%s1280_s17 + $0x38] sm:$0xff]  ;;  %v930_v25 = vpack.c.bf16 %v280_v17, %v279_v15  ;;  %v900_v26 = vpack.c.bf16 %v266_v19, %v265_v18 }
  0x30   : > { %917 = vmatprep.subr.bf16.mxu1 %v916_v42  ;;  %377 = vmatmul.mubr.f32.vlgmr.msra.gmra.mrb[0].mxu0 %v169_v48  ;;  %v174_v23 = vld [vmem:[%s1280_s17 + $0x28] sm:$0xff]  ;;  %v249_v27 = vld [vmem:[%s1575_s1 + $0x240] sm:$0xff]  ;;  %v932_v30 = vpack.c.bf16 %v298_v21, %v297_v20  ;;  %v267_v32 = vld [vmem:[%s1575_s1 + $0x2d0] sm:$0xff] }
  0x31   : > { %887 = vmatpush3.bf16.msra.mxu0 %v886_v49  ;;  %v250_v28 = vld [vmem:[%s1575_s1 + $0x248] sm:$0xff]  ;;  %v281_v29 = vld [vmem:[%s1575_s1 + $0x340] sm:$0xff]  ;;  %v268_v33 = vld [vmem:[%s1575_s1 + $0x2d8] sm:$0xff]  ;;  %516 = vmatprep.mubr.f32.mxu0 %v174_v23 }
  0x32   : > { %447 = vmatmul.mubr.f32.vlgmr.msra.gmra.mrb[0].mxu1 %v171_v50  ;;  %889 = vmatprep.subr.bf16.mxu0 %v888_v52  ;;  %v282_v31 = vld [vmem:[%s1575_s1 + $0x348] sm:$0xff]  ;;  %v299_v34 = vld [vmem:[%s1575_s1 + $0x3d0] sm:$0xff]  ;;  %v300_v35 = vld [vmem:[%s1575_s1 + $0x3d8] sm:$0xff]  ;;  %v902_v36 = vpack.c.bf16 %v250_v28, %v249_v27  ;;  %v904_v38 = vpack.c.bf16 %v268_v33, %v267_v32 }
  0x33   : > { %919 = vmatpush3.bf16.msra.mxu1 %v918_v51  ;;  %586 = vmatprep.mubr.f32.mxu1 %v176_v24  ;;  %v934_v37 = vpack.c.bf16 %v282_v31, %v281_v29  ;;  %v251_v39 = vld [vmem:[%s1575_s1 + $0x250] sm:$0xff]  ;;  %v252_v40 = vld [vmem:[%s1575_s1 + $0x258] sm:$0xff]  ;;  %v936_v42 = vpack.c.bf16 %v300_v35, %v299_v34  ;;  %v269_v44 = vld [vmem:[%s1575_s1 + $0x2e0] sm:$0xff] }
  0x34   : > { %921 = vmatprep.subr.bf16.mxu1 %v920_v56  ;;  %v283_v41 = vld [vmem:[%s1575_s1 + $0x350] sm:$0xff]  ;;  %v284_v43 = vld [vmem:[%s1575_s1 + $0x358] sm:$0xff]  ;;  %v270_v45 = vld [vmem:[%s1575_s1 + $0x2e8] sm:$0xff]  ;;  %v906_v48 = vpack.c.bf16 %v252_v40, %v251_v39 }
  0x35   : > { %891 = vmatpush3.bf16.msra.mxu0 %v890_v62  ;;  %v301_v46 = vld [vmem:[%s1575_s1 + $0x3e0] sm:$0xff]  ;;  %v302_v47 = vld [vmem:[%s1575_s1 + $0x3e8] sm:$0xff]  ;;  %v938_v49 = vpack.c.bf16 %v284_v43, %v283_v41  ;;  %v908_v50 = vpack.c.bf16 %v270_v45, %v269_v44  ;;  %v271_v56 = vld [vmem:[%s1575_s1 + $0x2f0] sm:$0xff] }
  0x36   : > { %893 = vmatprep.subr.bf16.mxu0 %v892_v0  ;;  %v253_v51 = vld [vmem:[%s1575_s1 + $0x260] sm:$0xff]  ;;  %v254_v52 = vld [vmem:[%s1575_s1 + $0x268] sm:$0xff]  ;;  %v940_v54 = vpack.c.bf16 %v302_v47, %v301_v46  ;;  %v272_v57 = vld [vmem:[%s1575_s1 + $0x2f8] sm:$0xff] }
  0x37   : > { %923 = vmatpush3.bf16.msra.mxu1 %v922_v63  ;;  %v285_v53 = vld [vmem:[%s1575_s1 + $0x360] sm:$0xff]  ;;  %v286_v55 = vld [vmem:[%s1575_s1 + $0x368] sm:$0xff]  ;;  %v303_v58 = vld [vmem:[%s1575_s1 + $0x3f0] sm:$0xff]  ;;  %v910_v60 = vpack.c.bf16 %v254_v52, %v253_v51  ;;  %v912_v62 = vpack.c.bf16 %v272_v57, %v271_v56 }
  0x38   : > { %925 = vmatprep.subr.bf16.mxu1 %v924_v4  ;;  %v304_v59 = vld [vmem:[%s1575_s1 + $0x3f8] sm:$0xff]  ;;  %v942_v61 = vpack.c.bf16 %v286_v55, %v285_v53  ;;  %v255_v63 = vld [vmem:[%s1575_s1 + $0x270] sm:$0xff]  ;;  %v173_v6 = vld [vmem:[%s1280_s17 + $0x20] sm:$0xff] }
  0x39   : > { %895 = vmatpush3.bf16.msra.mxu0 %v894_v10  ;;  %v256_v0 = vld [vmem:[%s1575_s1 + $0x278] sm:$0xff]  ;;  %v944_v1 = vpack.c.bf16 %v304_v59, %v303_v58  ;;  %v287_v2 = vld [vmem:[%s1575_s1 + $0x370] sm:$0xff]  ;;  %v674_v9 = vld [vmem:[%s1576_s2] ss:$0 sm:$0xff] }
  0x3a   : > { %897 = vmatprep.subr.bf16.mxu0 %v896_v12  ;;  %v288_v3 = vld [vmem:[%s1575_s1 + $0x378] sm:$0xff]  ;;  %v914_v4 = vpack.c.bf16 %v256_v0, %v255_v63  ;;  %v175_v7 = vld [vmem:[%s1280_s17 + $0x30] sm:$0xff]  ;;  %s676_s17 = sshll.u32 %s1093_s16, 7  ;;  %s1051_s16 = smov [#allocation2]  }
  0x3b   : > { %927 = vmatpush3.bf16.msra.mxu1 %v926_v11  ;;  %v946_v5 = vpack.c.bf16 %v288_v3, %v287_v2  ;;  %s1532_s5 = scalar_lea.hbm %s1577_s3, %s676_s17  ;;  %s991_s8 = sshll.u32 %s1051_s16, 4  ;;  %s992_s8 = int_to_ptr.vmem [resolvable:$false] %s991_s8 }
  0x3c   : > { %929 = vmatprep.subr.bf16.mxu1 %v928_v16  ;;  %s993_s9 = scalar_lea.vmem %s992_s8, 256  ;;  %p994_p0 = scmp.lt.s32.totalorder %s1534_s24, %s992_s8 }
  0x3d   : > { %899 = vmatpush3.bf16.msra.mxu0 %v898_v22  ;;  %p995_p1 = scmp.lt.s32.totalorder %s993_s9, %s987_s7 }
  0x3e   : > { %901 = vmatprep.subr.bf16.mxu0 %v900_v26 }
  0x3f   : > { %931 = vmatpush3.bf16.msra.mxu1 %v930_v25  ;;  %p996_p2 = por %p995_p1, %p994_p0 }
  0x40   : > { %933 = vmatprep.subr.bf16.mxu1 %v932_v30 }
  0x41   : > { %903 = vmatpush3.bf16.msra.mxu0 %v902_v36  ;;  %p997_p3 = pnand %p996_p2, %p990_p13 }
  0x42   : > { %905 = vmatprep.subr.bf16.mxu0 %v904_v38 }
  0x43   : > { %935 = vmatpush3.bf16.msra.mxu1 %v934_v37 }
  0x44   : > { %937 = vmatprep.subr.bf16.mxu1 %v936_v42 }
  0x45   : > { %907 = vmatpush3.bf16.msra.mxu0 %v906_v48 }
  0x46   : > { %909 = vmatprep.subr.bf16.mxu0 %v908_v50 }
  0x47   : > { %939 = vmatpush3.bf16.msra.mxu1 %v938_v49 }
  0x48   : > { %941 = vmatprep.subr.bf16.mxu1 %v940_v54 }
  0x49   : > { %911 = vmatpush3.bf16.msra.mxu0 %v910_v60 }
  0x4a   : > { %913 = vmatprep.subr.bf16.mxu0 %v912_v62 }
  0x4b   : > { %943 = vmatpush3.bf16.msra.mxu1 %v942_v61 }
  0x4c   : > { %945 = vmatprep.subr.bf16.mxu1 %v944_v1 }
  0x4d   : > { %915 = vmatpush3.bf16.msra.mxu0 %v914_v4 }
  0x4f   : > { %947 = vmatpush3.bf16.msra.mxu1 %v946_v5 }
  0x50   : > { %517 = vmatmul.mubr.f32.vlgmr.msra.gmra.mrb[2].mxu0 %v173_v6 }
  0x52   : > { %587 = vmatmul.mubr.f32.vlgmr.msra.gmra.mrb[2].mxu1 %v175_v7 }
 0x103   : > { %v712_v8 = vpop.f32.mrb[0].mxu0 }
 0x104   : > { %v713_v10 = vpop.f32.mrb[1].mxu0 }
 0x105   : > { %v747_v11 = vpop.f32.mrb[0].mxu1  ;;  %v714_v12 = vadd.f32 %v713_v10, %v712_v8 }
 0x106   : > { %v748_v13 = vpop.f32.mrb[1].mxu1 }
 0x107   : > { %v749_v14 = vadd.f32 %v748_v13, %v747_v11  ;;  %v379_v15 = vadd.f32 %v714_v12, %v674_v9 }
 0x109   : > { %v449_v16 = vadd.f32 %v749_v14, %v379_v15 }
 0x123   : > { %v782_v17 = vpop.f32.mrb[2].mxu0 }
 0x124   : > { %v783_v18 = vpop.f32.mrb[3].mxu0 }
 0x125   : > { %v817_v19 = vpop.f32.mrb[2].mxu1  ;;  %v784_v20 = vadd.f32 %v783_v18, %v782_v17 }
 0x126   : > { %v818_v21 = vpop.f32.mrb[3].mxu1 }
 0x127   : > { %v819_v22 = vadd.f32 %v818_v21, %v817_v19  ;;  %v519_v23 = vadd.f32 %v784_v20, %v449_v16 }
 0x129   : > { %v589_v24 = vadd.f32 %v819_v22, %v519_v23 }
 0x12b   : > { %593 = vst.msk [vmem:[%s163_s30] sm:$0xff] %vm592_vm0, %v589_v24 }
 0x12c   : > { %1000 = shalt.err (!%p997_p3)
}
 0x12d   : > { %s1001_s10 = scalar_lea.hbm %s1532_s5, 128  ;;  %s1005_s25 = scalar_lea.hbm %s1577_s3, 256 }
 0x12e   : > { %p1002_p4 = scmp.ne.s32.totalorder %s1532_s5, %s1001_s10  ;;  %p1006_p9 = scmp.lt.u32.totalorder %s1532_s5, %s1577_s3 }
 0x12f   : > { %p1007_p10 = scmp.lt.u32.totalorder %s1005_s25, %s1001_s10  ;;  %p1009_p12 = scmp.lt.u32.totalorder %s1001_s10, %s1532_s5 }
 0x130   : > { %p1003_p7 = pnand %p1002_p4, %p1110_p5 }
 0x131   : > { %p1008_p11 = por %p1007_p10, %p1006_p9 }
 0x132   : > { %p1004_p8 = pneg %p1003_p7 }
 0x133   : > { %p1010_p13 = por %p1009_p12, %p1008_p11 }
 0x135   : > { %p1011_p0 = pnand %p1010_p13, %p1004_p8 }
 0x137   : > { %1014 = shalt.err (!%p1011_p0)
}
 0x138   : > { %948 = dma.vmem_to_hbm [thread:$0]  (%p1110_p5), %s1534_s24, 128, %s1532_s5, %s595_s6  }
 0x139 PF: > { %p954_p1 = scmp.ge.s32.totalorder %s1049_s15, 2  ;;  %s620_s28 = sand.u32 1, %s1037_s12  }
 0x13a   : > { %s621_s29 = scalar_lea.sflag [#allocation3], %s620_s28 }
 0x13b   : > { %p951_p2 = pnand %p954_p1, %p1114_p6 }
 0x13d   : > { %1032 = dma.done.wait (!%p951_p2), %s621_s29, 128  }
 0x13e   : > { %1034 = vsyncadd (!%p951_p2), %s621_s29, 4294967168  ;;  %p13_p3 = scmp.ge.s32.totalorder %s1097_s18, 4   ;;  %s1580_s12 = smov %s1041_s13 }
 0x13f   : > { %s1581_s13 = smov %s1045_s14  ;;  %s1582_s14 = smov %s1108_s21 }
 0x140   : > { %s1583_s15 = smov %s1097_s18  ;;  %15 = sbr.rel (!%p13_p3) target bundleno = 3 (0x3), region = 67 }
 0x147   :  { %626 = vsyncpa [#allocation3], 1 }
 0x148   :  { %628 = vsyncpa [#allocation3 + $0x1], 1 }

</bundles_post_ra>
